<compile_context>
chip_gen: v5e
topology: v5e:2x2
jax: 0.10.0
libtpu: 0.0.40
codegen_flags: <defaults>
</compile_context>

<pallas_src>
import jax
import jax.numpy as jnp
from jax.experimental import pallas as pl
from jax.experimental.pallas import tpu as pltpu  # noqa: F401  (TPU backend assumed)

# Static shape configuration (small, consistent with the module's forward).
BATCH = 2
N_IN = 6
FEAT = 32                               # channel width of each of x1..x6
C_TOTAL = N_IN * FEAT                   # channels of v1 (=192)
SIZE = 64                               # `size` used for the v3 slice
SIZE_EFF = min(SIZE, C_TOTAL)           # PyTorch slice semantics clamp to width
C_OUT = C_TOTAL + SIZE_EFF              # channels of v4 (=256, lane-dense 2x128)


def _cat_slice_cat_kernel(x1_ref, x2_ref, x3_ref, x4_ref, x5_ref, x6_ref,
                          out_ref):
    """Inputs: six (BATCH, FEAT) refs; out_ref: (BATCH, C_OUT).

    Builds v4 = cat([v1, v1[:, :SIZE]], axis=1) fully in vregs and does a
    single lane-dense 256-wide unmasked store.
    """
    parts = [x1_ref[...], x2_ref[...], x3_ref[...],
             x4_ref[...], x5_ref[...], x6_ref[...]]      # each (BATCH, FEAT)
    v1 = jnp.concatenate(parts, axis=-1)                  # (BATCH, C_TOTAL)
    v3 = v1[:, :SIZE_EFF]                                 # (BATCH, SIZE_EFF)
    out_ref[...] = jnp.concatenate([v1, v3], axis=-1)     # one 256-wide store


def model_forward(x1, x2, x3, x4, x5, x6):
    dtype = x1.dtype
    # Six operands passed directly — no wrapper-side stack/concat, so there is
    # no extra XLA op or HBM round trip before the kernel. Pallas issues (and
    # overlaps) the six tiny input DMAs itself via default full-array specs.
    return pl.pallas_call(
        _cat_slice_cat_kernel,
        out_shape=jax.ShapeDtypeStruct((BATCH, C_OUT), dtype),
        # No grid / default full-array BlockSpecs: everything lives in VMEM;
        # the kernel is a single fused copy/concat.
    )(x1, x2, x3, x4, x5, x6)


def _reference(xs):
    v1 = jnp.concatenate(xs, axis=1)
    v3 = v1[:, :SIZE_EFF]
    return jnp.concatenate([v1, v3], axis=1)


if __name__ == "__main__":
    key = jax.random.PRNGKey(0)
    keys = jax.random.split(key, N_IN)
    xs = [
        jax.random.normal(k, (BATCH, FEAT), dtype=jnp.float32)
        for k in keys
    ]

    out = model_forward(*xs)
    out = jax.block_until_ready(out)

    ref = _reference(xs)
    assert out.shape == (BATCH, C_OUT), out.shape
    assert jnp.allclose(out, ref), "mismatch vs reference"

    print("KERNEL_OK")
</pallas_src>

<mosaic_0001>
module attributes {stable_mosaic.version = 11 : i64} {
  func.func @_cat_slice_cat_kernel(%arg0: memref<2x32xf32, #tpu.memory_space<vmem>>, %arg1: memref<2x32xf32, #tpu.memory_space<vmem>>, %arg2: memref<2x32xf32, #tpu.memory_space<vmem>>, %arg3: memref<2x32xf32, #tpu.memory_space<vmem>>, %arg4: memref<2x32xf32, #tpu.memory_space<vmem>>, %arg5: memref<2x32xf32, #tpu.memory_space<vmem>>, %arg6: memref<2x256xf32, #tpu.memory_space<vmem>>) attributes {dimension_semantics = [], scalar_prefetch = 0 : i64, scratch_operands = 0 : i64, tpu.core_type = #tpu.core_type<tc>} {
    %c0 = arith.constant 0 : index
    %c0_0 = arith.constant 0 : index
    %0 = vector.load %arg0[%c0, %c0_0] : memref<2x32xf32, #tpu.memory_space<vmem>>, vector<2x32xf32>
    %c0_1 = arith.constant 0 : index
    %c0_2 = arith.constant 0 : index
    %1 = vector.load %arg1[%c0_1, %c0_2] : memref<2x32xf32, #tpu.memory_space<vmem>>, vector<2x32xf32>
    %c0_3 = arith.constant 0 : index
    %c0_4 = arith.constant 0 : index
    %2 = vector.load %arg2[%c0_3, %c0_4] : memref<2x32xf32, #tpu.memory_space<vmem>>, vector<2x32xf32>
    %c0_5 = arith.constant 0 : index
    %c0_6 = arith.constant 0 : index
    %3 = vector.load %arg3[%c0_5, %c0_6] : memref<2x32xf32, #tpu.memory_space<vmem>>, vector<2x32xf32>
    %c0_7 = arith.constant 0 : index
    %c0_8 = arith.constant 0 : index
    %4 = vector.load %arg4[%c0_7, %c0_8] : memref<2x32xf32, #tpu.memory_space<vmem>>, vector<2x32xf32>
    %c0_9 = arith.constant 0 : index
    %c0_10 = arith.constant 0 : index
    %5 = vector.load %arg5[%c0_9, %c0_10] : memref<2x32xf32, #tpu.memory_space<vmem>>, vector<2x32xf32>
    %6 = tpu.concatenate %0, %1, %2, %3, %4, %5 in 1 : vector<2x32xf32>, vector<2x32xf32>, vector<2x32xf32>, vector<2x32xf32>, vector<2x32xf32>, vector<2x32xf32> -> vector<2x192xf32>
    %7 = vector.extract_strided_slice %6 {offsets = [0, 0], sizes = [2, 64], strides = [1, 1]} : vector<2x192xf32> to vector<2x64xf32>
    %8 = tpu.concatenate %6, %7 in 1 : vector<2x192xf32>, vector<2x64xf32> -> vector<2x256xf32>
    %c0_11 = arith.constant 0 : index
    %c0_12 = arith.constant 0 : index
    %9 = vector.load %arg6[%c0_11, %c0_12] : memref<2x256xf32, #tpu.memory_space<vmem>>, vector<2x256xf32>
    tpu.vector_store %arg6[%c0_11, %c0_12], %8 {strides = array<i32>} : memref<2x256xf32, #tpu.memory_space<vmem>>, vector<2x256xf32>,
    return
  }
}

</mosaic_0001>

<bundles_post_ra>
// kernel: tpu_custom_call.1
= control target key start
LH: loop header
LB: loop body
LE: loop exit
PB: predicated region body
PF: predicated region fallthrough
CT: control target
= control target key end

     0   :  { %11 = vsyncpa [#allocation3], 0  ;;  %s338_s0 = inlined_call_operand.hbm [shape: f32[2,32], index: 0, kind: input, shape index: {}]   ;;  %s339_s1 = inlined_call_operand.hbm [shape: f32[2,32], index: 1, kind: input, shape index: {}]   ;;  %s340_s2 = inlined_call_operand.hbm [shape: f32[2,32], index: 2, kind: input, shape index: {}]   ;;  %s341_s3 = inlined_call_operand.vmem [shape: f32[2,32], index: 3, kind: input, shape index: {}]   ;;  %s342_s4 = inlined_call_operand.hbm [shape: f32[2,32], index: 4, kind: input, shape index: {}]   ;;  %s343_s5 = inlined_call_operand.vmem [shape: f32[2,32], index: 5, kind: input, shape index: {}]   ;;  %s344_s6 = inlined_call_operand.hbm [shape: f32[2,256], index: 6, kind: output, shape index: {}]  }
   0x1   :  { %12 = vsyncpa [#allocation6], 0 }
   0x2   :  { %13 = vsyncpa [#allocation9], 0  ;;  %s31_s23 = sshll.u32 %s339_s1, 4  ;;  %s32_s23 = int_to_ptr.hbm [resolvable:$true] %s31_s23 }
   0x3   :  { %14 = vsyncpa [#allocation4], 0  ;;  %s274_s24 = smov [#allocation5]   ;;  %s20_s28 = sshll.u32 %s338_s0, 4  ;;  %s21_s28 = int_to_ptr.hbm [resolvable:$true] %s20_s28 }
   0x4   :  { %s33_s25 = sshll.u32 %s274_s24, 4  ;;  %s275_s29 = smov [#allocation2]   ;;  %s34_s25 = int_to_ptr.vmem [resolvable:$true] %s33_s25 }
   0x5   :  { %36 = dma.hbm_to_vmem [thread:$0]  %s32_s23, 32, %s34_s25, [#allocation6]  }
   0x6   :  { %s22_s30 = sshll.u32 %s275_s29, 4  ;;  %s42_s9 = sshll.u32 %s340_s2, 4  ;;  %s23_s30 = int_to_ptr.vmem [resolvable:$true] %s22_s30  ;;  %s43_s9 = int_to_ptr.hbm [resolvable:$true] %s42_s9 }
   0x7   :  { %25 = dma.hbm_to_vmem [thread:$0]  %s21_s28, 32, %s23_s30, [#allocation3]  }
   0x8   :  { %s55_s11 = sshll.u32 %s342_s4, 4  ;;  %s276_s12 = smov [#allocation7]   ;;  %s56_s11 = int_to_ptr.hbm [resolvable:$true] %s55_s11 }
   0x9   :  { %s44_s13 = sshll.u32 %s276_s12, 4  ;;  %s277_s0 = smov [#allocation8]   ;;  %s45_s13 = int_to_ptr.vmem [resolvable:$true] %s44_s13 }
   0xa   :  { %47 = dma.hbm_to_vmem [thread:$0]  %s43_s9, 32, %s45_s13, [#allocation6]  }
   0xb   :  { %s57_s14 = sshll.u32 %s277_s0, 4  ;;  %s58_s14 = int_to_ptr.vmem [resolvable:$true] %s57_s14 }
   0xc   :  { %60 = dma.hbm_to_vmem [thread:$0]  %s56_s11, 32, %s58_s14, [#allocation9]  }
   0xd   :  { %266 = dma.done.wait [#allocation3], 32  }
   0xe   :  { %267 = vsyncadd [#allocation3], 4294967264 }
   0xf   :  { %268 = dma.done.wait [#allocation6], 64  }
  0x10   :  { %269 = vsyncadd [#allocation6], 4294967232 }
  0x11   :  { %270 = dma.done.wait [#allocation9], 32  }
  0x12   :  { %271 = vsyncadd [#allocation9], 4294967264  ;;  %v80_v0 = vld [vmem:[#allocation5] sm:$0x3]  ;;  %v82_v1 = vld [vmem:[%s341_s3] sm:$0x3] }
  0x13   :  { %s278_s4 = smov 32   ;;  %s279_s16 = smov 96   ;;  %v81_v2 = vld [vmem:[#allocation7] sm:$0x3]  ;;  %v84_v3 = vld [vmem:[%s343_s5] sm:$0x3] }
  0x14   :  { %86 = vrot.lane.b32.xlu0 %v80_v0, %s278_s4  ;;  %94 = vrot.lane.b32.xlu1 %v82_v1, %s279_s16  ;;  %s280_s19 = smov 64   ;;  %vm101_vm0 = vcmask 261120   ;;  %v79_v5 = vld [vmem:[#allocation2] sm:$0x3]  ;;  %vm103_vm1 = vcmask 523264   ;;  %vm105_vm2 = vcmask 785408  }
  0x15   :  { %v83_v11 = vld [vmem:[#allocation8] sm:$0x3]  ;;  %s281_s3 = smov [#allocation10]   ;;  %s126_s22 = sshll.u32 %s344_s6, 4  ;;  %vm115_vm3 = vcmask 1041408   ;;  %s127_s22 = int_to_ptr.hbm [resolvable:$true] %s126_s22 }
  0x16   :  { %s124_s5 = sshll.u32 %s281_s3, 4  ;;  %s125_s5 = int_to_ptr.vmem [resolvable:$true] %s124_s5 }
  0x1c   :  { %90 = vrot.lane.b32.xlu0 %v81_v2, %s280_s19  ;;  %98 = vrot.lane.b32.xlu1 %v84_v3, %s278_s4 }
  0x86   :  { %v87_v4 = vpop.permute.xlu0 %86  ;;  %v95_v6 = vpop.permute.xlu1 %94 }
  0x87   :  { %v102_v7 = vsel %vm101_vm0, %v79_v5, %v87_v4 }
  0x8e   :  { %v91_v8 = vpop.permute.xlu0 %90  ;;  %v99_v12 = vpop.permute.xlu1 %98 }
  0x8f   :  { %v104_v9 = vsel %vm103_vm1, %v102_v7, %v91_v8  ;;  %v107_v13 = vsel %vm101_vm0, %v83_v11, %v99_v12 }
  0x90   :  { %v106_v10 = vsel %vm105_vm2, %v104_v9, %v95_v6 }
  0x91   :  { %109 = vrot.lane.b32.xlu2 %v106_v10, %s280_s19 }
  0xeb   :  { %v110_v14 = vpop.permute.xlu2 %109 }
  0xec   :  { %v112_v15 = vsel %vm103_vm1, %v107_v13, %v110_v14 }
  0xed   :  { %v114_v16 = vrot.slane %v112_v15, 6 }
  0xef   :  { %v116_v17 = vsel %vm115_vm3, %v106_v10, %v114_v16 }
  0xf0   :  { %118 = vst [vmem:[#allocation10] sm:$0xf] %v116_v17 }
  0xf1   :  { %129 = dma.vmem_to_hbm [thread:$0]  %s125_s5, 64, %s127_s22, [#allocation4]  }
  0xf2   :  { %272 = dma.done.wait [#allocation4], 64  }
  0xf3   :  { %273 = vsyncadd [#allocation4], 4294967232 }
  0xf4   :  { %134 = vsyncpa [#allocation3], 1 }
  0xf5   :  { %135 = vsyncpa [#allocation6], 1 }
  0xf6   :  { %136 = vsyncpa [#allocation9], 1 }
  0xf7   :  { %137 = vsyncpa [#allocation4], 1 }

</bundles_post_ra>
